<compile_context>
chip_gen: v6e
topology: v6e:2x2x1
jax: 0.10.0
libtpu: 0.0.40
codegen_flags: <defaults>
</compile_context>

<pallas_src>
import math

import jax
import jax.numpy as jnp
from jax.experimental import pallas as pl
from jax.experimental.pallas import tpu as pltpu


def _pos_emb_kernel(x_ref, wpm_ref, o_ref):
    # x_ref: (TB, 1) f32, wpm_ref: (3, dim+1) f32, o_ref: (TB, dim+1)
    x = x_ref[...]                              # (TB, 1)
    w = wpm_ref[0:1, :]                         # (1, dim+1) 2*pi*weights (col 0 is 0)
    p = wpm_ref[1:2, :]                         # (1, dim+1) phase (pi/2 on the cos half)
    m = wpm_ref[2:3, :]                         # (1, dim+1) one-hot column-0 mask
    s = jnp.sin(x * w + p)                      # col 0 is sin(0) = 0 exactly
    o_ref[...] = (s + x * m).astype(o_ref.dtype)   # splice raw x into column 0


def _round_up(n: int, m: int) -> int:
    return ((n + m - 1) // m) * m


def random_or_learned_sinusoidal_pos_emb(
    x: jax.Array, weights: jax.Array, *, out_dtype=jnp.float32
) -> jax.Array:
    """x: (B,) timesteps, weights: (half_dim,) -> (B, 2*half_dim + 1)."""
    B = x.shape[0]
    half_dim = weights.shape[0]
    dim = 2 * half_dim
    out_dim = dim + 1

    # Hoisted (wrapper-side) frequency/phase/mask table, merged into one resident input.
    w2pi = weights.astype(jnp.float32) * jnp.float32(2.0 * math.pi)
    zero1 = jnp.zeros((1,), jnp.float32)
    w_row = jnp.concatenate([zero1, w2pi, w2pi])                                  # (dim+1,)
    p_row = jnp.concatenate(
        [zero1,
         jnp.zeros((half_dim,), jnp.float32),
         jnp.full((half_dim,), jnp.float32(math.pi / 2.0))])                      # (dim+1,)
    m_row = jnp.zeros((out_dim,), jnp.float32).at[0].set(1.0)                     # (dim+1,)
    wpm = jnp.stack([w_row, p_row, m_row], axis=0)                                # (3, dim+1)

    xf = x.astype(jnp.float32).reshape(B, 1)

    # Batch tiling: one big tile for small B (per-step overhead dominates there);
    # >= 2 "parallel" grid steps for large B so v7x's two TensorCores both get work,
    # capped at 32K rows per tile (~4.3 MB f32 output tile, well inside scoped VMEM).
    TB_MAX = 32768
    B8 = _round_up(B, 8)
    if B8 <= 4096:
        TB = B8
    else:
        TB = min(TB_MAX, _round_up(pl.cdiv(B8, 2), 8))
    grid = (pl.cdiv(B, TB),)   # ragged last block is masked by Pallas; no pad / no out[:B]

    itemsize = jnp.dtype(out_dtype).itemsize
    cost = pl.CostEstimate(
        flops=3 * B * out_dim,
        transcendentals=B * out_dim,
        bytes_accessed=B * 4 + 3 * out_dim * 4 + B * out_dim * itemsize,
    )

    out = pl.pallas_call(
        _pos_emb_kernel,
        out_shape=jax.ShapeDtypeStruct((B, out_dim), out_dtype),
        grid=grid,
        in_specs=[
            pl.BlockSpec((TB, 1), lambda i: (i, 0)),         # x tile (batch-tiled)
            pl.BlockSpec((3, out_dim), lambda i: (0, 0)),    # freq/phase/mask table (resident)
        ],
        out_specs=pl.BlockSpec((TB, out_dim), lambda i: (i, 0)),
        compiler_params=pltpu.CompilerParams(dimension_semantics=("parallel",)),
        cost_estimate=cost,
    )(xf, wpm)

    return out


def _reference(x: jax.Array, weights: jax.Array) -> jax.Array:
    """Faithful JAX port of RandomOrLearnedSinusoidalPosEmb.forward."""
    x2 = x.astype(jnp.float32)[:, None]
    freqs = x2 * weights.astype(jnp.float32)[None, :] * (2.0 * math.pi)
    fouriered = jnp.concatenate([jnp.sin(freqs), jnp.cos(freqs)], axis=-1)
    return jnp.concatenate([x2, fouriered], axis=-1)


if __name__ == "__main__":
    key = jax.random.PRNGKey(0)
    kx, kw = jax.random.split(key)

    # Primary small-shape check (module-consistent: batch of scalar timesteps).
    B, DIM = 8, 32
    half_dim = DIM // 2
    x = jax.random.uniform(kx, (B,), dtype=jnp.float32)
    weights = jax.random.normal(kw, (half_dim,), dtype=jnp.float32)

    out = jax.block_until_ready(random_or_learned_sinusoidal_pos_emb(x, weights))
    ref = _reference(x, weights)
    assert out.shape == (B, DIM + 1), out.shape
    assert out.dtype == jnp.float32
    assert jnp.allclose(out, ref, atol=1e-4, rtol=1e-4), "mismatch vs reference (small)"

    # Secondary check: ragged batch (not a multiple of 8) exercising the masked last block,
    # verifying the pad-free / slice-free path.
    B2 = 260
    x2 = jax.random.uniform(kx, (B2,), dtype=jnp.float32)
    out2 = jax.block_until_ready(random_or_learned_sinusoidal_pos_emb(x2, weights))
    ref2 = _reference(x2, weights)
    assert out2.shape == (B2, DIM + 1)
    assert jnp.allclose(out2, ref2, atol=1e-4, rtol=1e-4), "mismatch vs reference (ragged)"

    # Tertiary check: batch large enough to use a multi-step "parallel" grid (v7x megacore
    # path) with a ragged final block.
    B3 = 4100
    x3 = jax.random.uniform(kx, (B3,), dtype=jnp.float32)
    out3 = jax.block_until_ready(random_or_learned_sinusoidal_pos_emb(x3, weights))
    ref3 = _reference(x3, weights)
    assert out3.shape == (B3, DIM + 1)
    assert jnp.allclose(out3, ref3, atol=1e-4, rtol=1e-4), "mismatch vs reference (multi-step)"

    print("KERNEL_OK")
</pallas_src>

<mosaic_0001>
module attributes {stable_mosaic.version = 11 : i64} {
  func.func @_pos_emb_kernel(%arg0: i32, %arg1: memref<8x1xf32, #tpu.memory_space<vmem>>, %arg2: memref<3x33xf32, #tpu.memory_space<vmem>>, %arg3: memref<8x33xf32, #tpu.memory_space<vmem>>) attributes {dimension_semantics = [#tpu.dimension_semantics<parallel>], iteration_bounds = array<i64: 1>, scalar_prefetch = 0 : i64, scratch_operands = 0 : i64, tpu.core_type = #tpu.core_type<tc>, window_params = [{transform_indices = @transform_0, window_bounds = array<i64: 8, 1>}, {pipeline_mode = #tpu.pipeline_mode<synchronous>, transform_indices = @transform_1, window_bounds = array<i64: 3, 33>}, {transform_indices = @transform_2, window_bounds = array<i64: 8, 33>}]} {
    %c0 = arith.constant 0 : index
    %c0_0 = arith.constant 0 : index
    %0 = vector.load %arg1[%c0, %c0_0] : memref<8x1xf32, #tpu.memory_space<vmem>>, vector<8x1xf32>
    %c0_1 = arith.constant 0 : index
    %c0_2 = arith.constant 0 : index
    %1 = vector.load %arg2[%c0_1, %c0_2] : memref<3x33xf32, #tpu.memory_space<vmem>>, vector<1x33xf32>
    %c1 = arith.constant 1 : index
    %c0_3 = arith.constant 0 : index
    %2 = vector.load %arg2[%c1, %c0_3] : memref<3x33xf32, #tpu.memory_space<vmem>>, vector<1x33xf32>
    %c2 = arith.constant 2 : index
    %c0_4 = arith.constant 0 : index
    %3 = vector.load %arg2[%c2, %c0_4] : memref<3x33xf32, #tpu.memory_space<vmem>>, vector<1x33xf32>
    %4 = vector.broadcast %0 : vector<8x1xf32> to vector<8x33xf32>
    %5 = vector.broadcast %1 : vector<1x33xf32> to vector<8x33xf32>
    %6 = arith.mulf %4, %5 : vector<8x33xf32>
    %7 = vector.broadcast %2 : vector<1x33xf32> to vector<8x33xf32>
    %8 = arith.addf %6, %7 : vector<8x33xf32>
    %9 = math.sin %8 : vector<8x33xf32>
    %10 = vector.broadcast %0 : vector<8x1xf32> to vector<8x33xf32>
    %11 = vector.broadcast %3 : vector<1x33xf32> to vector<8x33xf32>
    %12 = arith.mulf %10, %11 : vector<8x33xf32>
    %13 = arith.addf %9, %12 : vector<8x33xf32>
    %c0_5 = arith.constant 0 : index
    %c0_6 = arith.constant 0 : index
    %14 = vector.load %arg3[%c0_5, %c0_6] : memref<8x33xf32, #tpu.memory_space<vmem>>, vector<8x33xf32>
    tpu.vector_store %arg3[%c0_5, %c0_6], %13 {strides = array<i32>} : memref<8x33xf32, #tpu.memory_space<vmem>>, vector<8x33xf32>,
    return
  }
  func.func @transform_0(%arg0: i32) -> (i32, i32) {
    %c0_i32 = arith.constant 0 : i32
    %c0_i32_0 = arith.constant 0 : i32
    return %arg0, %c0_i32 : i32, i32
  }
  func.func @transform_1(%arg0: i32) -> (i32, i32) {
    %c0_i32 = arith.constant 0 : i32
    %c0_i32_0 = arith.constant 0 : i32
    %c0_i32_1 = arith.constant 0 : i32
    return %c0_i32, %c0_i32_0 : i32, i32
  }
  func.func @transform_2(%arg0: i32) -> (i32, i32) {
    %c0_i32 = arith.constant 0 : i32
    %c0_i32_0 = arith.constant 0 : i32
    return %arg0, %c0_i32 : i32, i32
  }
}

</mosaic_0001>

<bundles_post_ra>
// kernel: tpu_custom_call.1
= control target key start
LH: loop header
LB: loop body
LE: loop exit
PB: predicated region body
PF: predicated region fallthrough
CT: control target
= control target key end

     0   :  { %v203_v1 = vmov 0   ;;  %s266_s0 = inlined_call_operand.vmem [shape: f32[8,1], index: 0, kind: input, shape index: {}]   ;;  %s267_s1 = inlined_call_operand.vmem [shape: f32[3,33], index: 1, kind: input, shape index: {}]   ;;  %s268_s2 = inlined_call_operand.hbm [shape: f32[8,33], index: 2, kind: output, shape index: {}]  }
   0x1   :  { %v12_v0 = vld [vmem:[%s266_s0] sm:$0xff]  ;;  %176 = vset.pattern.permute.xlu0 %v203_v1 }
   0x2   :  { %18 = vperm.xlu0 %176, %v12_v0  }
   0x3   :  { %7 = vsyncpa [#allocation3], 0  ;;  %v157_v2 = vld [vmem:[%s267_s1] ss:$0 sm:$0xff]  ;;  %v158_v3 = vld [vmem:[%s267_s1 + $0x1] ss:$0 sm:$0xff] }
   0x4   :  { %v204_v17 = vmov 683565275   ;;  %v205_v19 = vmov 2475754826   ;;  %v206_v22 = vmov 2131351028  }
   0x5   :  { %v207_v25 = vmov 2102212464   ;;  %v208_v28 = vmov 920167782   ;;  %v209_v31 = vmov 1326507024  }
   0x6   :  { %s210_s16 = smov [#allocation2]   ;;  %vm141_vm13 = vcmask 269312  }
   0x7   :  { %s149_s17 = sshll.u32 %s210_s16, 4  ;;  %s150_s17 = int_to_ptr.vmem [resolvable:$true] %s149_s17 }
   0x8   :  { %s181_s18 = scalar_lea.vmem %s150_s17, 128  ;;  %p186_p1 = scmp.lt.s32.totalorder %s150_s17, %s150_s17 }
   0x9   :  { %p182_p0 = scmp.ne.s32.totalorder %s150_s17, %s181_s18  ;;  %p187_p2 = scmp.lt.s32.totalorder %s181_s18, %s181_s18 }
   0xb   :  { %p188_p3 = por %p187_p2, %p186_p1 }
   0xd   :  { %p189_p4 = pnand %p188_p3, %p182_p0 }
  0x7d   :  { %v235_v4 = vpop.permute.xlu0 %18 }
  0x7e   :  { %v25_v5 = vmul.f32 %v157_v2, %v235_v4 }
  0x80   :  { %v238_v6 = vadd.f32 %v158_v3, %v25_v5 }
  0x82   :  { %v34_v7 = vand.u32 2139095040, %v238_v6  ;;  %v31_v11 = vand.u32 2147483647, %v238_v6  ;;  %vm33_vm7 = vcmp.lt.s32.totalorder %v238_v6, 0  ;;  %vm123_vm12 = vweird.f32 %v238_v6 }
  0x84   :  { %v35_v8 = vshrl.u32 %v34_v7, 23  ;;  %v38_v14 = vand.u32 8388607, %v31_v11  ;;  %vm32_vm8 = vcmp.le.f32.partialorder %v31_v11, 0.7853982 }
  0x86   :  { %v159_v9 = vadd.s32 4294967169, %v35_v8  ;;  %v39_v33 = vor.u32 8388608, %v38_v14 }
  0x88   :  { %v41_v10 = vadd.s32 1, %v159_v9  ;;  %v79_v47 = vshll.u32 %v39_v33, 8 }
  0x8a   :  { %vm42_vm0 = vcmp.gt.s32.totalorder %v41_v10, 0 }
  0x8b   :  { %v43_v12 = vsel %vm42_vm0, %v41_v10, 0 }
  0x8c   :  { %v45_v13 = vand.u32 31, %v43_v12  ;;  %v44_v16 = vshrl.u32 %v43_v12, 5 }
  0x8e   :  { %v46_v15 = vsub.s32 32, %v45_v13  ;;  %v48_v18 = vshll.u32 %v204_v17, %v45_v13  ;;  %v51_v20 = vshll.u32 %v205_v19, %v45_v13  ;;  %v54_v24 = vshll.u32 %v206_v22, %v45_v13 }
  0x8f   :  { %v57_v27 = vshll.u32 %v207_v25, %v45_v13  ;;  %v60_v30 = vshll.u32 %v208_v28, %v45_v13  ;;  %vm63_vm1 = vcmp.lt.s32.totalorder %v44_v16, 1  ;;  %vm66_vm2 = vcmp.lt.s32.totalorder %v44_v16, 4 }
  0x90   :  { %v49_v21 = vshrl.u32 %v205_v19, %v46_v15  ;;  %v52_v23 = vshrl.u32 %v206_v22, %v46_v15  ;;  %v55_v26 = vshrl.u32 %v207_v25, %v46_v15  ;;  %v58_v29 = vshrl.u32 %v208_v28, %v46_v15 }
  0x91   :  { %v61_v32 = vshrl.u32 %v209_v31, %v46_v15  ;;  %v47_v42 = vshrl.u32 %v204_v17, %v46_v15  ;;  %vm65_vm3 = vcmp.lt.s32.totalorder %v44_v16, 3  ;;  %vm64_vm4 = vcmp.lt.s32.totalorder %v44_v16, 2 }
  0x92   :  { %v50_v34 = vor.u32 %v49_v21, %v48_v18  ;;  %v53_v35 = vor.u32 %v52_v23, %v51_v20  ;;  %v56_v36 = vor.u32 %v55_v26, %v54_v24  ;;  %v59_v37 = vor.u32 %v58_v29, %v57_v27 }
  0x93   :  { %v62_v38 = vor.u32 %v61_v32, %v60_v30  ;;  %v163_v32 = vld [vmem:[%s267_s1 + $0x2] ss:$0 sm:$0xff] }
  0x94   :  { %v68_v39 = vsel %vm66_vm2, %v56_v36, 2102212464  ;;  %v71_v40 = vsel %vm63_vm1, %v50_v34, %v53_v35  ;;  %v75_v41 = vsel %vm63_vm1, %v53_v35, %v56_v36  ;;  %v72_v43 = vsel %vm66_vm2, %v59_v37, 920167782 }
  0x95   :  { %v76_v44 = vsel %vm66_vm2, %v62_v38, 1326507024  ;;  %v73_v45 = vsel %vm65_vm3, %v56_v36, %v72_v43  ;;  %v67_v48 = vsel %vm63_vm1, %v47_v42, %v50_v34  ;;  %v69_v49 = vsel %vm65_vm3, %v53_v35, %v68_v39 }
  0x96   :  { %v77_v46 = vsel %vm65_vm3, %v59_v37, %v76_v44  ;;  %v74_v50 = vsel %vm64_vm4, %v71_v40, %v73_v45  ;;  %v70_v56 = vsel %vm64_vm4, %v67_v48, %v69_v49  ;;  %v139_v36 = vmul.f32 %v163_v32, %v235_v4 }
  0x97   :  { %v78_v51 = vsel %vm64_vm4, %v75_v41, %v77_v46  ;;  %v247_v54 = vmul.u32.u64.low %v79_v47, %v74_v50  ;;  %v248_v55 = vmul.u32.u64.high %v79_v47, %v74_v50, %v247_v54  ;;  %v86_v58 = vmul.u32 %v79_v47, %v70_v56 }
  0x98   :  { %v244_v52 = vmul.u32.u64.low %v79_v47, %v78_v51  ;;  %v245_v53 = vmul.u32.u64.high %v79_v47, %v78_v51, %v244_v52 }
  0x99   :  { %v89_v57 = vadd.s32 1, %v248_v55 }
  0x9a   :  { %vm88_vm5 = vc.u32 %v245_v53, %v247_v54  ;;  %v87_v8 = vadd.s32 %v247_v54, %v245_v53 }
  0x9b   :  { %v90_v59 = vsel %vm88_vm5, %v89_v57, %v248_v55 }
  0x9c   :  { %v91_v60 = vadd.s32 %v90_v59, %v86_v58 }
  0x9e   :  { %v92_v61 = vadd.s32 536870912, %v91_v60 }
  0xa0   :  { %v93_v62 = vshrl.u32 %v92_v61, 30 }
  0xa2   :  { %v94_v63 = vshll.u32 %v93_v62, 30  ;;  %v117_v22 = vsub.s32 4, %v93_v62 }
  0xa4   :  { %v95_v0 = vsub.s32 %v91_v60, %v94_v63  ;;  %v118_v25 = vsel %vm33_vm7, %v117_v22, %v93_v62 }
  0xa5   :  { %v120_v26 = vsel %vm32_vm8, 0, %v118_v25 }
  0xa6   :  { %v97_v1 = vsub.s32 0, %v95_v0  ;;  %v124_v27 = vadd.s32 3, %v120_v26 }
  0xa8   :  { %v160_v2 = vmin.u32 %v97_v1, %v95_v0  ;;  %v125_v28 = vand.u32 3, %v124_v27 }
  0xaa   :  { %v99_v3 = vclz %v160_v2  ;;  %vm130_vm9 = vcmp.eq.s32.totalorder %v125_v28, 2  ;;  %vm127_vm10 = vcmp.eq.s32.totalorder %v125_v28, 0  ;;  %vm126_vm11 = vcmp.lt.s32.totalorder %v125_v28, 2 }
  0xac   :  { %v161_v5 = vadd.s32 4294967294, %v99_v3 }
  0xae   :  { %vm162_vm6 = vcmp.lt.s32.totalorder %v161_v5, 0 }
  0xaf   :  { %v102_v7 = vsel %vm162_vm6, 0, %v161_v5 }
  0xb0   :  { %v103_v9 = vsub.s32 32, %v102_v7  ;;  %v107_v10 = vsub.s32 4294967266, %v102_v7  ;;  %v104_v12 = vshll.u32 %v95_v0, %v102_v7 }
  0xb2   :  { %v105_v13 = vshrl.u32 %v87_v8, %v103_v9  ;;  %v108_v14 = vadd.s32 127, %v107_v10 }
  0xb4   :  { %v106_v15 = vor.u32 %v105_v13, %v104_v12  ;;  %v109_v16 = vshll.u32 %v108_v14, 23 }
  0xb6   :  { %v110_v17 = vor.u32 4788187, %v109_v16  ;;  %v113_v19 = vcvt.s32.f32 %v106_v15 }
  0xb8   :  { %v111_v18 = vand.u32 2147483647, %v110_v17 }
  0xba   :  { %v114_v20 = vmul.f32 %v113_v19, %v111_v18 }
  0xbc   :  { %v115_v21 = vxor.u32 2147483648, %v114_v20 }
  0xbe   :  { %v116_v23 = vsel %vm33_vm7, %v115_v21, %v114_v20 }
  0xbf   :  { %v119_v24 = vsel %vm32_vm8, %v238_v6, %v116_v23 }
  0xc0   :  { %177 = vcosq.f32 %v119_v24 }
  0xc1   :  { %179 = vsinq.f32 %v119_v24 }
  0xcd   :  { %v178_v29 = vpop.eup %177 }
  0xce   :  { %v180_v30 = vpop.eup %179  ;;  %v131_v31 = vxor.u32 2147483648, %v178_v29 }
  0xcf   :  { %v128_v33 = vxor.u32 2147483648, %v180_v30 }
  0xd0   :  { %v132_v11 = vsel %vm130_vm9, %v131_v31, %v180_v30 }
  0xd1   :  { %v129_v34 = vsel %vm127_vm10, %v178_v29, %v128_v33 }
  0xd2   :  { %v133_v35 = vsel %vm126_vm11, %v129_v34, %v132_v11 }
  0xd3   :  { %v134_v37 = vsel %vm123_vm12, nan, %v133_v35 }
  0xd4   :  { %v140_v38 = vadd.f32 %v139_v36, %v134_v37 }
  0xd6   :  { %142 = vst.msk [vmem:[#allocation2] sm:$0xff] %vm141_vm13, %v140_v38 }
  0xd7   :  { %192 = shalt.err (!%p189_p4)
}
  0xd8   :  { %152 = dma.vmem_to_hbm [thread:$0]  %s150_s17, 128, %s268_s2, [#allocation3]  }
  0xd9   :  { %201 = dma.done.wait [#allocation3], 128  }
  0xda   :  { %202 = vsyncadd [#allocation3], 4294967168 }
  0xdb   :  { %156 = vsyncpa [#allocation3], 1 }

</bundles_post_ra>
